<compile_context>
chip_gen: v5e
topology: v5e:2x2
jax: 0.10.0
libtpu: 0.0.40
codegen_flags: <defaults>
</compile_context>

<pallas_src>
import functools

import jax
import jax.numpy as jnp
from jax.experimental import pallas as pl
from jax.experimental.pallas import tpu as pltpu

N_INNER_LAYERS = 5
N_CRELU_LAYERS = N_INNER_LAYERS + 1  # inner layers + output layer all consume CReLU
LANE = 128
SUBLANE = 8


def _round_up(n, m):
    return ((n + m - 1) // m) * m


def _pad2d(a, rows, cols):
    return jnp.pad(a, ((0, rows - a.shape[0]), (0, cols - a.shape[1])))


def _pad_row(b, cols):
    b = jnp.reshape(b, (-1,))
    return jnp.pad(b, (0, cols - b.shape[0]))


# ---------------------------------------------------------------------------
# Kernel
# ---------------------------------------------------------------------------
def mlp_crelu_kernel(x_ref, w0_ref, w_ref, b_ref, out_ref):
    """One batch tile through the whole trunk.

    x_ref : (tb, F)         bf16  — raw input rows (K not lane-padded)
    w0_ref: (F, P)          bf16  — layer-0 weight, out-dim zero-padded to P
    w_ref : (2*L, P, P)     bf16  — [Wd_1, Ws_1, ..., Wd_L, Ws_L] stacked
    b_ref : (L+1, P)        f32   — [b_0, b_1, ..., b_L]
    out_ref: (tb, P)        f32

    Each CReLU+Linear pair is h @ Wd + |h| @ Ws + b, algebraically identical
    to cat(relu(h), relu(-h)) @ W + b.  MXU operands are bf16, accumulation
    stays f32.  Zero-padded lanes stay exactly zero through every layer.
    """
    h = (
        jnp.dot(x_ref[...], w0_ref[...], preferred_element_type=jnp.float32)
        + b_ref[0]
    )
    for l in range(N_CRELU_LAYERS):
        wd = w_ref[2 * l]
        ws = w_ref[2 * l + 1]
        h = (
            jnp.dot(h.astype(jnp.bfloat16), wd, preferred_element_type=jnp.float32)
            + jnp.dot(
                jnp.abs(h).astype(jnp.bfloat16), ws,
                preferred_element_type=jnp.float32,
            )
            + b_ref[l + 1]
        )
    out_ref[...] = h


# ---------------------------------------------------------------------------
# One-time parameter preparation (hoisted out of the forward pass)
# ---------------------------------------------------------------------------
def prepare_params(params):
    """Fold / pad / pack / cast the PyTorch-style params once.

    params: list of (w, b) with w shaped (in, out) (PyTorch weights
    pre-transposed), b shaped (1, out).
    """
    w0, b0 = params[0]
    f = w0.shape[0]
    n_out = params[-1][0].shape[1]
    pmax = max(_round_up(f, LANE), _round_up(n_out, LANE))

    w0_p = _pad2d(w0, f, pmax).astype(jnp.bfloat16)          # (F, P)
    w_list, b_list = [], [_pad_row(b0, pmax)]
    for w, b in params[1:]:
        w_pos, w_neg = w[:f], w[f:]
        w_list.append(_pad2d((w_pos - w_neg) * 0.5, pmax, pmax))   # Wd
        w_list.append(_pad2d((w_pos + w_neg) * 0.5, pmax, pmax))   # Ws
        b_list.append(_pad_row(b, pmax))
    w_stack = jnp.stack(w_list).astype(jnp.bfloat16)          # (2L, P, P)
    b_stack = jnp.stack(b_list).astype(jnp.float32)           # (L+1, P)

    return {
        "w0": w0_p,
        "w_stack": w_stack,
        "b_stack": b_stack,
        "n_in": f,
        "n_out": n_out,
        "pmax": pmax,
    }


# ---------------------------------------------------------------------------
# Forward
# ---------------------------------------------------------------------------
def _pick_batch_tile(batch, block_b):
    """Batch tile (multiple of 8) that minimizes row padding, prefers large
    tiles, and keeps >=2 grid steps when batch >= 16 so the 'parallel' axis
    actually spans both of v7x's TensorCores."""
    b8 = _round_up(max(batch, 1), SUBLANE)
    cap = min(block_b, b8)
    if batch >= 16:
        cap = min(cap, _round_up(-(-b8 // 2), SUBLANE))
    cap = max(cap, SUBLANE)

    best_tb, best_pad = SUBLANE, _round_up(batch, SUBLANE)
    for tb in range(SUBLANE, cap + 1, SUBLANE):
        pad = _round_up(batch, tb)
        if pad < best_pad or (pad == best_pad and tb > best_tb):
            best_tb, best_pad = tb, pad
    return best_tb, best_pad


@functools.partial(jax.jit, static_argnames=("tb", "b_pad", "n_out"))
def _forward_impl(x, w0, w_stack, b_stack, *, tb, b_pad, n_out):
    batch, f = x.shape
    pmax = w_stack.shape[-1]
    n_w = w_stack.shape[0]
    n_b = b_stack.shape[0]

    # Rows-only padding + bf16 cast (no lane padding of x — first matmul uses K=F).
    x_p = jnp.pad(x, ((0, b_pad - batch), (0, 0))).astype(jnp.bfloat16)

    out_p = pl.pallas_call(
        mlp_crelu_kernel,
        out_shape=jax.ShapeDtypeStruct((b_pad, pmax), jnp.float32),
        grid=(b_pad // tb,),
        in_specs=[
            pl.BlockSpec((tb, f), lambda i: (i, 0)),
            # Weights / biases stay VMEM-resident across all batch tiles.
            pl.BlockSpec((f, pmax), lambda i: (0, 0)),
            pl.BlockSpec((n_w, pmax, pmax), lambda i: (0, 0, 0)),
            pl.BlockSpec((n_b, pmax), lambda i: (0, 0)),
        ],
        out_specs=pl.BlockSpec((tb, pmax), lambda i: (i, 0)),
        compiler_params=pltpu.CompilerParams(
            # Batch tiles are independent -> megacore sharding on v7x.
            dimension_semantics=("parallel",),
        ),
    )(x_p, w0, w_stack, b_stack)
    # TODO(synk): the final [:batch, :n_out] slice is one extra HBM copy; only
    # worth removing if profiling shows the forward is HBM-write bound.
    return out_p[:batch, :n_out]


def mymodel_forward(x, prepared, *, block_b=512):
    """x: (B, nInputFeatures) f32. prepared: output of prepare_params()."""
    tb, b_pad = _pick_batch_tile(x.shape[0], block_b)
    return _forward_impl(
        x,
        prepared["w0"],
        prepared["w_stack"],
        prepared["b_stack"],
        tb=tb,
        b_pad=b_pad,
        n_out=prepared["n_out"],
    )


# ---------------------------------------------------------------------------
# Reference + init (PyTorch-equivalent)
# ---------------------------------------------------------------------------
def init_params(key, n_input_features, n_output_features):
    """Deterministic PyTorch-style init: U(-1/sqrt(fan_in), +1/sqrt(fan_in))."""
    dims = (
        [(n_input_features, n_input_features)]
        + [(2 * n_input_features, n_input_features)] * N_INNER_LAYERS
        + [(2 * n_input_features, n_output_features)]
    )
    params = []
    for fan_in, fan_out in dims:
        key, kw, kb = jax.random.split(key, 3)
        bound = 1.0 / float(fan_in) ** 0.5
        w = jax.random.uniform(
            kw, (fan_in, fan_out), minval=-bound, maxval=bound, dtype=jnp.float32
        )
        b = jax.random.uniform(
            kb, (1, fan_out), minval=-bound, maxval=bound, dtype=jnp.float32
        )
        params.append((w, b))
    return params


def reference_forward(x, params):
    """Pure-JAX f32 reference mirroring the PyTorch forward (concat form)."""
    for w, b in params[:-1]:
        h = x @ w + b
        x = jnp.concatenate([jnp.maximum(h, 0.0), jnp.maximum(-h, 0.0)], axis=1)
    w, b = params[-1]
    return x @ w + b


if __name__ == "__main__":
    N_IN = 32   # config.nInputFeatures
    N_OUT = 16  # config.nOutputFeatures

    key = jax.random.PRNGKey(0)
    key, kx1, kx2 = jax.random.split(key, 3)
    params = init_params(key, N_IN, N_OUT)
    prepared = prepare_params(params)  # one-time host-side prep

    # Small example (single grid step).
    x1 = jax.random.normal(kx1, (8, N_IN), dtype=jnp.float32)
    out1 = jax.block_until_ready(mymodel_forward(x1, prepared))
    ref1 = reference_forward(x1, params)
    assert out1.shape == (8, N_OUT)
    assert jnp.allclose(out1, ref1, atol=5e-2, rtol=5e-2), (
        float(jnp.max(jnp.abs(out1 - ref1)))
    )

    # Multi-tile batch: 272 rows -> tb=136, 2 grid steps, zero row waste.
    x2 = jax.random.normal(kx2, (272, N_IN), dtype=jnp.float32)
    out2 = jax.block_until_ready(mymodel_forward(x2, prepared))
    ref2 = reference_forward(x2, params)
    assert out2.shape == (272, N_OUT)
    assert jnp.allclose(out2, ref2, atol=5e-2, rtol=5e-2), (
        float(jnp.max(jnp.abs(out2 - ref2)))
    )

    print("KERNEL_OK")
</pallas_src>

<mosaic_0001>
module attributes {stable_mosaic.version = 11 : i64} {
  func.func @mlp_crelu_kernel(%arg0: i32, %arg1: memref<8x32xbf16, #tpu.memory_space<vmem>>, %arg2: memref<32x128xbf16, #tpu.memory_space<vmem>>, %arg3: memref<12x128x128xbf16, #tpu.memory_space<vmem>>, %arg4: memref<7x128xf32, #tpu.memory_space<vmem>>, %arg5: memref<8x128xf32, #tpu.memory_space<vmem>>) attributes {dimension_semantics = [#tpu.dimension_semantics<parallel>], iteration_bounds = array<i64: 1>, scalar_prefetch = 0 : i64, scratch_operands = 0 : i64, tpu.core_type = #tpu.core_type<tc>, window_params = [{transform_indices = @transform_0, window_bounds = array<i64: 8, 32>}, {pipeline_mode = #tpu.pipeline_mode<synchronous>, transform_indices = @transform_1, window_bounds = array<i64: 32, 128>}, {pipeline_mode = #tpu.pipeline_mode<synchronous>, transform_indices = @transform_2, window_bounds = array<i64: 12, 128, 128>}, {pipeline_mode = #tpu.pipeline_mode<synchronous>, transform_indices = @transform_3, window_bounds = array<i64: 7, 128>}, {transform_indices = @transform_4, window_bounds = array<i64: 8, 128>}]} {
    %c0 = arith.constant 0 : index
    %c0_0 = arith.constant 0 : index
    %0 = vector.load %arg1[%c0, %c0_0] : memref<8x32xbf16, #tpu.memory_space<vmem>>, vector<8x32xbf16>
    %c0_1 = arith.constant 0 : index
    %c0_2 = arith.constant 0 : index
    %1 = vector.load %arg2[%c0_1, %c0_2] : memref<32x128xbf16, #tpu.memory_space<vmem>>, vector<32x128xbf16>
    %cst = arith.constant dense<0.000000e+00> : vector<8x128xf32>
    %2 = tpu.matmul %0, %1, %cst {dimension_numbers = #tpu.dot_dimension_numbers<[1], [0], [0], [1], [0, 0, 1, 1], [], []>} : vector<8x32xbf16>, vector<32x128xbf16>, vector<8x128xf32> -> vector<8x128xf32>
    %c0_3 = arith.constant 0 : index
    %c0_4 = arith.constant 0 : index
    %3 = vector.load %arg4[%c0_3, %c0_4] : memref<7x128xf32, #tpu.memory_space<vmem>>, vector<1x128xf32>
    %4 = vector.shape_cast %3 : vector<1x128xf32> to vector<128xf32>
    %5 = vector.shape_cast %4 : vector<128xf32> to vector<1x128xf32>
    %6 = vector.broadcast %5 : vector<1x128xf32> to vector<8x128xf32>
    %7 = arith.addf %2, %6 : vector<8x128xf32>
    %c0_5 = arith.constant 0 : index
    %c0_6 = arith.constant 0 : index
    %c0_7 = arith.constant 0 : index
    %8 = vector.load %arg3[%c0_5, %c0_6, %c0_7] : memref<12x128x128xbf16, #tpu.memory_space<vmem>>, vector<1x128x128xbf16>
    %9 = vector.shape_cast %8 : vector<1x128x128xbf16> to vector<128x128xbf16>
    %c1 = arith.constant 1 : index
    %c0_8 = arith.constant 0 : index
    %c0_9 = arith.constant 0 : index
    %10 = vector.load %arg3[%c1, %c0_8, %c0_9] : memref<12x128x128xbf16, #tpu.memory_space<vmem>>, vector<1x128x128xbf16>
    %11 = vector.shape_cast %10 : vector<1x128x128xbf16> to vector<128x128xbf16>
    %12 = arith.truncf %7 : vector<8x128xf32> to vector<8x128xbf16>
    %cst_10 = arith.constant dense<0.000000e+00> : vector<8x128xf32>
    %13 = tpu.matmul %12, %9, %cst_10 {dimension_numbers = #tpu.dot_dimension_numbers<[1], [0], [0], [1], [0, 0, 1, 1], [], []>} : vector<8x128xbf16>, vector<128x128xbf16>, vector<8x128xf32> -> vector<8x128xf32>
    %14 = math.absf %7 : vector<8x128xf32>
    %15 = arith.truncf %14 : vector<8x128xf32> to vector<8x128xbf16>
    %cst_11 = arith.constant dense<0.000000e+00> : vector<8x128xf32>
    %16 = tpu.matmul %15, %11, %cst_11 {dimension_numbers = #tpu.dot_dimension_numbers<[1], [0], [0], [1], [0, 0, 1, 1], [], []>} : vector<8x128xbf16>, vector<128x128xbf16>, vector<8x128xf32> -> vector<8x128xf32>
    %17 = arith.addf %13, %16 : vector<8x128xf32>
    %c1_12 = arith.constant 1 : index
    %c0_13 = arith.constant 0 : index
    %18 = vector.load %arg4[%c1_12, %c0_13] : memref<7x128xf32, #tpu.memory_space<vmem>>, vector<1x128xf32>
    %19 = vector.shape_cast %18 : vector<1x128xf32> to vector<128xf32>
    %20 = vector.shape_cast %19 : vector<128xf32> to vector<1x128xf32>
    %21 = vector.broadcast %20 : vector<1x128xf32> to vector<8x128xf32>
    %22 = arith.addf %17, %21 : vector<8x128xf32>
    %c2 = arith.constant 2 : index
    %c0_14 = arith.constant 0 : index
    %c0_15 = arith.constant 0 : index
    %23 = vector.load %arg3[%c2, %c0_14, %c0_15] : memref<12x128x128xbf16, #tpu.memory_space<vmem>>, vector<1x128x128xbf16>
    %24 = vector.shape_cast %23 : vector<1x128x128xbf16> to vector<128x128xbf16>
    %c3 = arith.constant 3 : index
    %c0_16 = arith.constant 0 : index
    %c0_17 = arith.constant 0 : index
    %25 = vector.load %arg3[%c3, %c0_16, %c0_17] : memref<12x128x128xbf16, #tpu.memory_space<vmem>>, vector<1x128x128xbf16>
    %26 = vector.shape_cast %25 : vector<1x128x128xbf16> to vector<128x128xbf16>
    %27 = arith.truncf %22 : vector<8x128xf32> to vector<8x128xbf16>
    %cst_18 = arith.constant dense<0.000000e+00> : vector<8x128xf32>
    %28 = tpu.matmul %27, %24, %cst_18 {dimension_numbers = #tpu.dot_dimension_numbers<[1], [0], [0], [1], [0, 0, 1, 1], [], []>} : vector<8x128xbf16>, vector<128x128xbf16>, vector<8x128xf32> -> vector<8x128xf32>
    %29 = math.absf %22 : vector<8x128xf32>
    %30 = arith.truncf %29 : vector<8x128xf32> to vector<8x128xbf16>
    %cst_19 = arith.constant dense<0.000000e+00> : vector<8x128xf32>
    %31 = tpu.matmul %30, %26, %cst_19 {dimension_numbers = #tpu.dot_dimension_numbers<[1], [0], [0], [1], [0, 0, 1, 1], [], []>} : vector<8x128xbf16>, vector<128x128xbf16>, vector<8x128xf32> -> vector<8x128xf32>
    %32 = arith.addf %28, %31 : vector<8x128xf32>
    %c2_20 = arith.constant 2 : index
    %c0_21 = arith.constant 0 : index
    %33 = vector.load %arg4[%c2_20, %c0_21] : memref<7x128xf32, #tpu.memory_space<vmem>>, vector<1x128xf32>
    %34 = vector.shape_cast %33 : vector<1x128xf32> to vector<128xf32>
    %35 = vector.shape_cast %34 : vector<128xf32> to vector<1x128xf32>
    %36 = vector.broadcast %35 : vector<1x128xf32> to vector<8x128xf32>
    %37 = arith.addf %32, %36 : vector<8x128xf32>
    %c4 = arith.constant 4 : index
    %c0_22 = arith.constant 0 : index
    %c0_23 = arith.constant 0 : index
    %38 = vector.load %arg3[%c4, %c0_22, %c0_23] : memref<12x128x128xbf16, #tpu.memory_space<vmem>>, vector<1x128x128xbf16>
    %39 = vector.shape_cast %38 : vector<1x128x128xbf16> to vector<128x128xbf16>
    %c5 = arith.constant 5 : index
    %c0_24 = arith.constant 0 : index
    %c0_25 = arith.constant 0 : index
    %40 = vector.load %arg3[%c5, %c0_24, %c0_25] : memref<12x128x128xbf16, #tpu.memory_space<vmem>>, vector<1x128x128xbf16>
    %41 = vector.shape_cast %40 : vector<1x128x128xbf16> to vector<128x128xbf16>
    %42 = arith.truncf %37 : vector<8x128xf32> to vector<8x128xbf16>
    %cst_26 = arith.constant dense<0.000000e+00> : vector<8x128xf32>
    %43 = tpu.matmul %42, %39, %cst_26 {dimension_numbers = #tpu.dot_dimension_numbers<[1], [0], [0], [1], [0, 0, 1, 1], [], []>} : vector<8x128xbf16>, vector<128x128xbf16>, vector<8x128xf32> -> vector<8x128xf32>
    %44 = math.absf %37 : vector<8x128xf32>
    %45 = arith.truncf %44 : vector<8x128xf32> to vector<8x128xbf16>
    %cst_27 = arith.constant dense<0.000000e+00> : vector<8x128xf32>
    %46 = tpu.matmul %45, %41, %cst_27 {dimension_numbers = #tpu.dot_dimension_numbers<[1], [0], [0], [1], [0, 0, 1, 1], [], []>} : vector<8x128xbf16>, vector<128x128xbf16>, vector<8x128xf32> -> vector<8x128xf32>
    %47 = arith.addf %43, %46 : vector<8x128xf32>
    %c3_28 = arith.constant 3 : index
    %c0_29 = arith.constant 0 : index
    %48 = vector.load %arg4[%c3_28, %c0_29] : memref<7x128xf32, #tpu.memory_space<vmem>>, vector<1x128xf32>
    %49 = vector.shape_cast %48 : vector<1x128xf32> to vector<128xf32>
    %50 = vector.shape_cast %49 : vector<128xf32> to vector<1x128xf32>
    %51 = vector.broadcast %50 : vector<1x128xf32> to vector<8x128xf32>
    %52 = arith.addf %47, %51 : vector<8x128xf32>
    %c6 = arith.constant 6 : index
    %c0_30 = arith.constant 0 : index
    %c0_31 = arith.constant 0 : index
    %53 = vector.load %arg3[%c6, %c0_30, %c0_31] : memref<12x128x128xbf16, #tpu.memory_space<vmem>>, vector<1x128x128xbf16>
    %54 = vector.shape_cast %53 : vector<1x128x128xbf16> to vector<128x128xbf16>
    %c7 = arith.constant 7 : index
    %c0_32 = arith.constant 0 : index
    %c0_33 = arith.constant 0 : index
    %55 = vector.load %arg3[%c7, %c0_32, %c0_33] : memref<12x128x128xbf16, #tpu.memory_space<vmem>>, vector<1x128x128xbf16>
    %56 = vector.shape_cast %55 : vector<1x128x128xbf16> to vector<128x128xbf16>
    %57 = arith.truncf %52 : vector<8x128xf32> to vector<8x128xbf16>
    %cst_34 = arith.constant dense<0.000000e+00> : vector<8x128xf32>
    %58 = tpu.matmul %57, %54, %cst_34 {dimension_numbers = #tpu.dot_dimension_numbers<[1], [0], [0], [1], [0, 0, 1, 1], [], []>} : vector<8x128xbf16>, vector<128x128xbf16>, vector<8x128xf32> -> vector<8x128xf32>
    %59 = math.absf %52 : vector<8x128xf32>
    %60 = arith.truncf %59 : vector<8x128xf32> to vector<8x128xbf16>
    %cst_35 = arith.constant dense<0.000000e+00> : vector<8x128xf32>
    %61 = tpu.matmul %60, %56, %cst_35 {dimension_numbers = #tpu.dot_dimension_numbers<[1], [0], [0], [1], [0, 0, 1, 1], [], []>} : vector<8x128xbf16>, vector<128x128xbf16>, vector<8x128xf32> -> vector<8x128xf32>
    %62 = arith.addf %58, %61 : vector<8x128xf32>
    %c4_36 = arith.constant 4 : index
    %c0_37 = arith.constant 0 : index
    %63 = vector.load %arg4[%c4_36, %c0_37] : memref<7x128xf32, #tpu.memory_space<vmem>>, vector<1x128xf32>
    %64 = vector.shape_cast %63 : vector<1x128xf32> to vector<128xf32>
    %65 = vector.shape_cast %64 : vector<128xf32> to vector<1x128xf32>
    %66 = vector.broadcast %65 : vector<1x128xf32> to vector<8x128xf32>
    %67 = arith.addf %62, %66 : vector<8x128xf32>
    %c8 = arith.constant 8 : index
    %c0_38 = arith.constant 0 : index
    %c0_39 = arith.constant 0 : index
    %68 = vector.load %arg3[%c8, %c0_38, %c0_39] : memref<12x128x128xbf16, #tpu.memory_space<vmem>>, vector<1x128x128xbf16>
    %69 = vector.shape_cast %68 : vector<1x128x128xbf16> to vector<128x128xbf16>
    %c9 = arith.constant 9 : index
    %c0_40 = arith.constant 0 : index
    %c0_41 = arith.constant 0 : index
    %70 = vector.load %arg3[%c9, %c0_40, %c0_41] : memref<12x128x128xbf16, #tpu.memory_space<vmem>>, vector<1x128x128xbf16>
    %71 = vector.shape_cast %70 : vector<1x128x128xbf16> to vector<128x128xbf16>
    %72 = arith.truncf %67 : vector<8x128xf32> to vector<8x128xbf16>
    %cst_42 = arith.constant dense<0.000000e+00> : vector<8x128xf32>
    %73 = tpu.matmul %72, %69, %cst_42 {dimension_numbers = #tpu.dot_dimension_numbers<[1], [0], [0], [1], [0, 0, 1, 1], [], []>} : vector<8x128xbf16>, vector<128x128xbf16>, vector<8x128xf32> -> vector<8x128xf32>
    %74 = math.absf %67 : vector<8x128xf32>
    %75 = arith.truncf %74 : vector<8x128xf32> to vector<8x128xbf16>
    %cst_43 = arith.constant dense<0.000000e+00> : vector<8x128xf32>
    %76 = tpu.matmul %75, %71, %cst_43 {dimension_numbers = #tpu.dot_dimension_numbers<[1], [0], [0], [1], [0, 0, 1, 1], [], []>} : vector<8x128xbf16>, vector<128x128xbf16>, vector<8x128xf32> -> vector<8x128xf32>
    %77 = arith.addf %73, %76 : vector<8x128xf32>
    %c5_44 = arith.constant 5 : index
    %c0_45 = arith.constant 0 : index
    %78 = vector.load %arg4[%c5_44, %c0_45] : memref<7x128xf32, #tpu.memory_space<vmem>>, vector<1x128xf32>
    %79 = vector.shape_cast %78 : vector<1x128xf32> to vector<128xf32>
    %80 = vector.shape_cast %79 : vector<128xf32> to vector<1x128xf32>
    %81 = vector.broadcast %80 : vector<1x128xf32> to vector<8x128xf32>
    %82 = arith.addf %77, %81 : vector<8x128xf32>
    %c10 = arith.constant 10 : index
    %c0_46 = arith.constant 0 : index
    %c0_47 = arith.constant 0 : index
    %83 = vector.load %arg3[%c10, %c0_46, %c0_47] : memref<12x128x128xbf16, #tpu.memory_space<vmem>>, vector<1x128x128xbf16>
    %84 = vector.shape_cast %83 : vector<1x128x128xbf16> to vector<128x128xbf16>
    %c11 = arith.constant 11 : index
    %c0_48 = arith.constant 0 : index
    %c0_49 = arith.constant 0 : index
    %85 = vector.load %arg3[%c11, %c0_48, %c0_49] : memref<12x128x128xbf16, #tpu.memory_space<vmem>>, vector<1x128x128xbf16>
    %86 = vector.shape_cast %85 : vector<1x128x128xbf16> to vector<128x128xbf16>
    %87 = arith.truncf %82 : vector<8x128xf32> to vector<8x128xbf16>
    %cst_50 = arith.constant dense<0.000000e+00> : vector<8x128xf32>
    %88 = tpu.matmul %87, %84, %cst_50 {dimension_numbers = #tpu.dot_dimension_numbers<[1], [0], [0], [1], [0, 0, 1, 1], [], []>} : vector<8x128xbf16>, vector<128x128xbf16>, vector<8x128xf32> -> vector<8x128xf32>
    %89 = math.absf %82 : vector<8x128xf32>
    %90 = arith.truncf %89 : vector<8x128xf32> to vector<8x128xbf16>
    %cst_51 = arith.constant dense<0.000000e+00> : vector<8x128xf32>
    %91 = tpu.matmul %90, %86, %cst_51 {dimension_numbers = #tpu.dot_dimension_numbers<[1], [0], [0], [1], [0, 0, 1, 1], [], []>} : vector<8x128xbf16>, vector<128x128xbf16>, vector<8x128xf32> -> vector<8x128xf32>
    %92 = arith.addf %88, %91 : vector<8x128xf32>
    %c6_52 = arith.constant 6 : index
    %c0_53 = arith.constant 0 : index
    %93 = vector.load %arg4[%c6_52, %c0_53] : memref<7x128xf32, #tpu.memory_space<vmem>>, vector<1x128xf32>
    %94 = vector.shape_cast %93 : vector<1x128xf32> to vector<128xf32>
    %95 = vector.shape_cast %94 : vector<128xf32> to vector<1x128xf32>
    %96 = vector.broadcast %95 : vector<1x128xf32> to vector<8x128xf32>
    %97 = arith.addf %92, %96 : vector<8x128xf32>
    %c0_54 = arith.constant 0 : index
    %c0_55 = arith.constant 0 : index
    %98 = vector.load %arg5[%c0_54, %c0_55] : memref<8x128xf32, #tpu.memory_space<vmem>>, vector<8x128xf32>
    tpu.vector_store %arg5[%c0_54, %c0_55], %97 {strides = array<i32>} : memref<8x128xf32, #tpu.memory_space<vmem>>, vector<8x128xf32>,
    return
  }
  func.func @transform_0(%arg0: i32) -> (i32, i32) {
    %c0_i32 = arith.constant 0 : i32
    %c0_i32_0 = arith.constant 0 : i32
    return %arg0, %c0_i32 : i32, i32
  }
  func.func @transform_1(%arg0: i32) -> (i32, i32) {
    %c0_i32 = arith.constant 0 : i32
    %c0_i32_0 = arith.constant 0 : i32
    %c0_i32_1 = arith.constant 0 : i32
    return %c0_i32, %c0_i32_0 : i32, i32
  }
  func.func @transform_2(%arg0: i32) -> (i32, i32, i32) {
    %c0_i32 = arith.constant 0 : i32
    %c0_i32_0 = arith.constant 0 : i32
    %c0_i32_1 = arith.constant 0 : i32
    %c0_i32_2 = arith.constant 0 : i32
    return %c0_i32, %c0_i32_0, %c0_i32_1 : i32, i32, i32
  }
  func.func @transform_3(%arg0: i32) -> (i32, i32) {
    %c0_i32 = arith.constant 0 : i32
    %c0_i32_0 = arith.constant 0 : i32
    %c0_i32_1 = arith.constant 0 : i32
    return %c0_i32, %c0_i32_0 : i32, i32
  }
  func.func @transform_4(%arg0: i32) -> (i32, i32) {
    %c0_i32 = arith.constant 0 : i32
    %c0_i32_0 = arith.constant 0 : i32
    return %arg0, %c0_i32 : i32, i32
  }
}

</mosaic_0001>

<bundles_post_ra>
// kernel: _forward_impl.1
= control target key start
LH: loop header
LB: loop body
LE: loop exit
PB: predicated region body
PF: predicated region fallthrough
CT: control target
= control target key end

     0   :  { %9 = vsyncpa [#allocation3], 0  ;;  %s1721_s0 = inlined_call_operand.vmem [shape: bf16[8,32], index: 0, kind: input, shape index: {}]   ;;  %s1722_s1 = inlined_call_operand.hbm [shape: bf16[32,128], index: 1, kind: input, shape index: {}]   ;;  %s1723_s2 = inlined_call_operand.hbm [shape: bf16[12,128,128], index: 2, kind: input, shape index: {}]   ;;  %s1724_s3 = inlined_call_operand.vmem [shape: f32[7,128], index: 3, kind: input, shape index: {}]   ;;  %s1725_s4 = inlined_call_operand.hbm [shape: f32[8,128], index: 4, kind: output, shape index: {}]  }
   0x1   :  { %10 = vsyncpa [#allocation6], 0 }
   0x2   :  { %11 = vsyncpa [#allocation4], 0  ;;  %s18_s17 = sshll.u32 %s1722_s1, 4  ;;  %s1658_s18 = smov [#allocation2]   ;;  %s19_s17 = int_to_ptr.hbm [resolvable:$true] %s18_s17 }
   0x3   :  { %s20_s19 = sshll.u32 %s1658_s18, 4  ;;  %s31_s22 = sshll.u32 %s1723_s2, 4  ;;  %s21_s19 = int_to_ptr.vmem [resolvable:$true] %s20_s19  ;;  %s32_s22 = int_to_ptr.hbm [resolvable:$true] %s31_s22 }
   0x4   :  { %s1659_s23 = smov 64   ;;  %s1660_s24 = smov 4  }
   0x5   :  { %26 = dma.hbm_to_vmem [thread:$0]  %s19_s17, 256, %s21_s19, [#allocation3], %s1659_s23, %s1659_s23, %s1660_s24  }
   0x6   :  { %s1661_s25 = smov [#allocation5]  }
   0x7   :  { %s33_s26 = sshll.u32 %s1661_s25, 4  ;;  %s34_s26 = int_to_ptr.vmem [resolvable:$true] %s33_s26 }
   0x8   :  { %39 = dma.hbm_to_vmem [thread:$0]  %s32_s22, 12288, %s34_s26, [#allocation6], %s1659_s23, %s1659_s23, %s1660_s24  }
   0x9   :  { %1652 = dma.done.wait [#allocation3], 256  }
   0xa   :  { %1653 = vsyncadd [#allocation3], 4294967040 }
   0xb   :  { %1654 = dma.done.wait [#allocation6], 12288  }
   0xc   :  { %1655 = vsyncadd [#allocation6], 4294955008  ;;  %v1471_v0 = vld [vmem:[#allocation2 + $0x8] sm:$0xff]  ;;  %v1470_v3 = vld [vmem:[#allocation2] sm:$0xff]  ;;  %vm70_vm0 = vcmask 261120   ;;  %s1662_s14 = smov [#allocation7]  }
   0xd   :  { %v1479_v1 = vld [vmem:[#allocation5 + $0x38] sm:$0xff]  ;;  %80 = vmatpush.bf16.msra.mxu0 %v1471_v0  ;;  %v1478_v4 = vld [vmem:[#allocation5 + $0x30] sm:$0xff]  ;;  %v1477_v7 = vld [vmem:[#allocation5 + $0x28] sm:$0xff]  ;;  %s1064_s15 = sshll.u32 %s1662_s14, 4  ;;  %s1066_s18 = sshll.u32 %s1725_s4, 4  ;;  %s1065_s15 = int_to_ptr.vmem [resolvable:$true] %s1064_s15  ;;  %s1067_s18 = int_to_ptr.hbm [resolvable:$true] %s1066_s18 }
   0xe   :  { %v1487_v2 = vld [vmem:[#allocation5 + $0x78] sm:$0xff]  ;;  %232 = vmatpush.bf16.msra.mxu2 %v1479_v1  ;;  %v1486_v5 = vld [vmem:[#allocation5 + $0x70] sm:$0xff]  ;;  %v1485_v8 = vld [vmem:[#allocation5 + $0x68] sm:$0xff] }
   0xf   :  { %171 = vmatpush.bf16.msra.mxu1 %v1487_v2  ;;  %v51_v6 = vld [vmem:[%s1721_s0] sm:$0xf]  ;;  %v1476_v9 = vld [vmem:[#allocation5 + $0x20] sm:$0xff]  ;;  %v1475_v11 = vld [vmem:[#allocation5 + $0x18] sm:$0xff] }
  0x10   :  { %v1484_v10 = vld [vmem:[#allocation5 + $0x60] sm:$0xff]  ;;  %v1483_v12 = vld [vmem:[#allocation5 + $0x58] sm:$0xff]  ;;  %v1474_v13 = vld [vmem:[#allocation5 + $0x10] sm:$0xff] }
  0x11   :  { %81 = vmatpush.bf16.msra.mxu0 %v1470_v3  ;;  %v1482_v14 = vld [vmem:[#allocation5 + $0x50] sm:$0xff]  ;;  %v1473_v15 = vld [vmem:[#allocation5 + $0x8] sm:$0xff]  ;;  %v1472_v17 = vld [vmem:[#allocation5] sm:$0xff] }
  0x12   :  { %233 = vmatpush.bf16.msra.mxu2 %v1478_v4  ;;  %v1481_v16 = vld [vmem:[#allocation5 + $0x48] sm:$0xff]  ;;  %v1480_v18 = vld [vmem:[#allocation5 + $0x40] sm:$0xff]  ;;  %v1495_v19 = vld [vmem:[#allocation5 + $0xb8] sm:$0xff] }
  0x13   :  { %172 = vmatpush.bf16.msra.mxu1 %v1486_v5  ;;  %v1503_v20 = vld [vmem:[#allocation5 + $0xf8] sm:$0xff]  ;;  %v1494_v21 = vld [vmem:[#allocation5 + $0xb0] sm:$0xff]  ;;  %v1493_v23 = vld [vmem:[#allocation5 + $0xa8] sm:$0xff] }
  0x14   :  { %1085 = vmatmul.msk.bf16.vlgmr.msra.gmra.mxu0 %vm70_vm0, %v51_v6  ;;  %333 = vmatpush.bf16.msra.mxu3 %v1503_v20  ;;  %v1502_v22 = vld [vmem:[#allocation5 + $0xf0] sm:$0xff]  ;;  %v1501_v24 = vld [vmem:[#allocation5 + $0xe8] sm:$0xff]  ;;  %v1492_v25 = vld [vmem:[#allocation5 + $0xa0] sm:$0xff] }
  0x15   :  { %394 = vmatpush.bf16.msrb.mxu0 %v1495_v19  ;;  %v1500_v26 = vld [vmem:[#allocation5 + $0xe0] sm:$0xff]  ;;  %v1491_v27 = vld [vmem:[#allocation5 + $0x98] sm:$0xff]  ;;  %v1573_v29 = vld [vmem:[%s1724_s3] ss:$0 sm:$0xff] }
  0x16   :  { %234 = vmatpush.bf16.msra.mxu2 %v1477_v7  ;;  %v1499_v28 = vld [vmem:[#allocation5 + $0xd8] sm:$0xff]  ;;  %v1490_v36 = vld [vmem:[#allocation5 + $0x90] sm:$0xff]  ;;  %v1489_v38 = vld [vmem:[#allocation5 + $0x88] sm:$0xff] }
  0x17   :  { %173 = vmatpush.bf16.msra.mxu1 %v1485_v8  ;;  %v1498_v37 = vld [vmem:[#allocation5 + $0xd0] sm:$0xff]  ;;  %v1497_v39 = vld [vmem:[#allocation5 + $0xc8] sm:$0xff]  ;;  %v1488_v40 = vld [vmem:[#allocation5 + $0x80] sm:$0xff] }
  0x18   :  { %334 = vmatpush.bf16.msra.mxu3 %v1502_v22  ;;  %v1496_v41 = vld [vmem:[#allocation5 + $0xc0] sm:$0xff]  ;;  %v1511_v42 = vld [vmem:[#allocation5 + $0x138] sm:$0xff]  ;;  %v1510_v44 = vld [vmem:[#allocation5 + $0x130] sm:$0xff] }
  0x19   :  { %395 = vmatpush.bf16.msrb.mxu0 %v1494_v21  ;;  %v1519_v43 = vld [vmem:[#allocation5 + $0x178] sm:$0xff]  ;;  %v1518_v45 = vld [vmem:[#allocation5 + $0x170] sm:$0xff]  ;;  %v1509_v46 = vld [vmem:[#allocation5 + $0x128] sm:$0xff] }
  0x1a   :  { %235 = vmatpush.bf16.msra.mxu2 %v1476_v9  ;;  %v1517_v47 = vld [vmem:[#allocation5 + $0x168] sm:$0xff]  ;;  %v1508_v48 = vld [vmem:[#allocation5 + $0x120] sm:$0xff]  ;;  %v1574_v51 = vld [vmem:[%s1724_s3 + $0x1] ss:$0 sm:$0xff] }
  0x1b   :  { %174 = vmatpush.bf16.msra.mxu1 %v1484_v10  ;;  %v1516_v49 = vld [vmem:[#allocation5 + $0x160] sm:$0xff]  ;;  %v1507_v60 = vld [vmem:[#allocation5 + $0x118] sm:$0xff]  ;;  %v1506_v62 = vld [vmem:[#allocation5 + $0x110] sm:$0xff] }
  0x1c   :  { %335 = vmatpush.bf16.msra.mxu3 %v1501_v24  ;;  %v1515_v61 = vld [vmem:[#allocation5 + $0x158] sm:$0xff]  ;;  %v1514_v63 = vld [vmem:[#allocation5 + $0x150] sm:$0xff]  ;;  %v1505_v0 = vld [vmem:[#allocation5 + $0x108] sm:$0xff] }
  0x1d   :  { %396 = vmatpush.bf16.msrb.mxu0 %v1493_v23  ;;  %v1513_v1 = vld [vmem:[#allocation5 + $0x148] sm:$0xff]  ;;  %v1504_v2 = vld [vmem:[#allocation5 + $0x100] sm:$0xff]  ;;  %v1527_v4 = vld [vmem:[#allocation5 + $0x1b8] sm:$0xff] }
  0x1e   :  { %236 = vmatpush.bf16.msra.mxu2 %v1475_v11  ;;  %v1512_v3 = vld [vmem:[#allocation5 + $0x140] sm:$0xff]  ;;  %v1535_v5 = vld [vmem:[#allocation5 + $0x1f8] sm:$0xff]  ;;  %v1526_v6 = vld [vmem:[#allocation5 + $0x1b0] sm:$0xff] }
  0x1f   :  { %175 = vmatpush.bf16.msra.mxu1 %v1483_v12  ;;  %v1534_v7 = vld [vmem:[#allocation5 + $0x1f0] sm:$0xff]  ;;  %v1525_v8 = vld [vmem:[#allocation5 + $0x1a8] sm:$0xff]  ;;  %v1524_v10 = vld [vmem:[#allocation5 + $0x1a0] sm:$0xff] }
  0x20   :  { %336 = vmatpush.bf16.msra.mxu3 %v1500_v26  ;;  %v1533_v9 = vld [vmem:[#allocation5 + $0x1e8] sm:$0xff]  ;;  %v1532_v11 = vld [vmem:[#allocation5 + $0x1e0] sm:$0xff]  ;;  %v1523_v12 = vld [vmem:[#allocation5 + $0x198] sm:$0xff] }
  0x21   :  { %397 = vmatpush.bf16.msrb.mxu0 %v1492_v25  ;;  %v1522_v24 = vld [vmem:[#allocation5 + $0x190] sm:$0xff]  ;;  %v1521_v26 = vld [vmem:[#allocation5 + $0x188] sm:$0xff] }
  0x22   :  { %237 = vmatpush.bf16.msra.mxu2 %v1474_v13  ;;  %v1531_v13 = vld [vmem:[#allocation5 + $0x1d8] sm:$0xff]  ;;  %v1530_v25 = vld [vmem:[#allocation5 + $0x1d0] sm:$0xff] }
  0x23   :  { %176 = vmatpush.bf16.msra.mxu1 %v1482_v14 }
  0x24   :  { %337 = vmatpush.bf16.msra.mxu3 %v1499_v28  ;;  %v1520_v28 = vld [vmem:[#allocation5 + $0x180] sm:$0xff] }
  0x25   :  { %398 = vmatpush.bf16.msrb.mxu0 %v1491_v27  ;;  %v1529_v27 = vld [vmem:[#allocation5 + $0x1c8] sm:$0xff] }
  0x26   :  { %238 = vmatpush.bf16.msra.mxu2 %v1473_v15  ;;  %v1575_v15 = vld [vmem:[%s1724_s3 + $0x2] ss:$0 sm:$0xff] }
  0x27   :  { %177 = vmatpush.bf16.msra.mxu1 %v1481_v16 }
  0x28   :  { %338 = vmatpush.bf16.msra.mxu3 %v1498_v37  ;;  %v1548_v37 = vld [vmem:[#allocation5 + $0x260] sm:$0xff] }
  0x29   :  { %399 = vmatpush.bf16.msrb.mxu0 %v1490_v36  ;;  %v1540_v36 = vld [vmem:[#allocation5 + $0x220] sm:$0xff] }
  0x2a   :  { %239 = vmatpush.bf16.msra.mxu2 %v1472_v17 }
  0x2b   :  { %178 = vmatpush.bf16.msra.mxu1 %v1480_v18 }
  0x2c   :  { %339 = vmatpush.bf16.msra.mxu3 %v1497_v39  ;;  %v1576_v39 = vld [vmem:[%s1724_s3 + $0x3] ss:$0 sm:$0xff] }
  0x2d   :  { %400 = vmatpush.bf16.msrb.mxu0 %v1489_v38 }
  0x2e   :  { %556 = vmatpush.bf16.msrb.mxu2 %v1511_v42 }
  0x2f   :  { %495 = vmatpush.bf16.msrb.mxu1 %v1519_v43 }
  0x30   :  { %340 = vmatpush.bf16.msra.mxu3 %v1496_v41 }
  0x31   :  { %401 = vmatpush.bf16.msrb.mxu0 %v1488_v40 }
  0x32   :  { %557 = vmatpush.bf16.msrb.mxu2 %v1510_v44 }
  0x33   :  { %496 = vmatpush.bf16.msrb.mxu1 %v1518_v45 }
  0x34   :  { %657 = vmatpush.bf16.msrb.mxu3 %v1535_v5 }
  0x35   :  { %718 = vmatpush.bf16.msra.mxu0 %v1527_v4 }
  0x36   :  { %558 = vmatpush.bf16.msrb.mxu2 %v1509_v46 }
  0x37   :  { %497 = vmatpush.bf16.msrb.mxu1 %v1517_v47 }
  0x38   :  { %658 = vmatpush.bf16.msrb.mxu3 %v1534_v7 }
  0x39   :  { %719 = vmatpush.bf16.msra.mxu0 %v1526_v6 }
  0x3a   :  { %559 = vmatpush.bf16.msrb.mxu2 %v1508_v48  ;;  %v1539_v48 = vld [vmem:[#allocation5 + $0x218] sm:$0xff] }
  0x3b   :  { %498 = vmatpush.bf16.msrb.mxu1 %v1516_v49  ;;  %v1547_v49 = vld [vmem:[#allocation5 + $0x258] sm:$0xff] }
  0x3c   :  { %659 = vmatpush.bf16.msrb.mxu3 %v1533_v9 }
  0x3d   :  { %720 = vmatpush.bf16.msra.mxu0 %v1525_v8 }
  0x3e   :  { %560 = vmatpush.bf16.msrb.mxu2 %v1507_v60  ;;  %v1557_v60 = vld [vmem:[#allocation5 + $0x2a8] sm:$0xff] }
  0x3f   :  { %499 = vmatpush.bf16.msrb.mxu1 %v1515_v61  ;;  %v1565_v61 = vld [vmem:[#allocation5 + $0x2e8] sm:$0xff] }
  0x40   :  { %660 = vmatpush.bf16.msrb.mxu3 %v1532_v11 }
  0x41   :  { %721 = vmatpush.bf16.msra.mxu0 %v1524_v10 }
  0x42   :  { %561 = vmatpush.bf16.msrb.mxu2 %v1506_v62  ;;  %v1556_v62 = vld [vmem:[#allocation5 + $0x2a0] sm:$0xff] }
  0x43   :  { %500 = vmatpush.bf16.msrb.mxu1 %v1514_v63  ;;  %v1564_v63 = vld [vmem:[#allocation5 + $0x2e0] sm:$0xff] }
  0x44   :  { %661 = vmatpush.bf16.msrb.mxu3 %v1531_v13  ;;  %v1562_v13 = vld [vmem:[#allocation5 + $0x2d0] sm:$0xff] }
  0x45   :  { %722 = vmatpush.bf16.msra.mxu0 %v1523_v12  ;;  %v1554_v12 = vld [vmem:[#allocation5 + $0x290] sm:$0xff] }
  0x46   :  { %562 = vmatpush.bf16.msrb.mxu2 %v1505_v0  ;;  %v1555_v0 = vld [vmem:[#allocation5 + $0x298] sm:$0xff] }
  0x47   :  { %501 = vmatpush.bf16.msrb.mxu1 %v1513_v1  ;;  %v1563_v1 = vld [vmem:[#allocation5 + $0x2d8] sm:$0xff] }
  0x48   :  { %662 = vmatpush.bf16.msrb.mxu3 %v1530_v25 }
  0x49   :  { %723 = vmatpush.bf16.msra.mxu0 %v1522_v24 }
  0x4a   :  { %563 = vmatpush.bf16.msrb.mxu2 %v1504_v2 }
  0x4b   :  { %502 = vmatpush.bf16.msrb.mxu1 %v1512_v3  ;;  %v1577_v3 = vld [vmem:[%s1724_s3 + $0x4] ss:$0 sm:$0xff] }
  0x4c   :  { %663 = vmatpush.bf16.msrb.mxu3 %v1529_v27 }
  0x4d   :  { %724 = vmatpush.bf16.msra.mxu0 %v1521_v26 }
  0x51   :  { %725 = vmatpush.bf16.msra.mxu0 %v1520_v28 }
  0x91   :  { %v83_v30 = vpop.f32.mrf.mxu0 }
  0x92   :  { %v84_v31 = vadd.f32 %v1573_v29, %v83_v30  ;;  %v1528_v29 = vld [vmem:[#allocation5 + $0x1c0] sm:$0xff]  ;;  %v1543_v30 = vld [vmem:[#allocation5 + $0x238] sm:$0xff] }
  0x93   :  { %664 = vmatpush.bf16.msrb.mxu3 %v1528_v29  ;;  %v1579_v29 = vld [vmem:[%s1724_s3 + $0x6] ss:$0 sm:$0xff] }
  0x94   :  { %v120_v32 = vpack.c.bf16 %v84_v31, %v84_v31  ;;  %v121_v33 = vand.u32 2147483647, %v84_v31  ;;  %v1551_v31 = vld [vmem:[#allocation5 + $0x278] sm:$0xff] }
  0x96   :  { %240 = vmatmul.bf16.vlgmr.msra.gmra.mxu2 %v120_v32  ;;  %v122_v34 = vpack.c.bf16 %v121_v33, %v121_v33  ;;  %v1542_v32 = vld [vmem:[#allocation5 + $0x230] sm:$0xff] }
  0x97   :  { %880 = vmatpush.bf16.msra.mxu2 %v1543_v30  ;;  %v1550_v33 = vld [vmem:[#allocation5 + $0x270] sm:$0xff] }
  0x98   :  { %179 = vmatmul.bf16.vlgmr.msra.gmra.mxu1 %v122_v34  ;;  %v1541_v34 = vld [vmem:[#allocation5 + $0x228] sm:$0xff] }
  0x99   :  { %v85_v35 = vpop.f32.mrf.mxu0  ;;  %819 = vmatpush.bf16.msra.mxu1 %v1551_v31 }
  0x9a   :  { %v1549_v35 = vld [vmem:[#allocation5 + $0x268] sm:$0xff] }
  0x9b   :  { %881 = vmatpush.bf16.msra.mxu2 %v1542_v32 }
  0x9d   :  { %820 = vmatpush.bf16.msra.mxu1 %v1550_v33 }
  0x9f   :  { %882 = vmatpush.bf16.msra.mxu2 %v1541_v34 }
  0xa1   :  { %821 = vmatpush.bf16.msra.mxu1 %v1549_v35 }
  0xa3   :  { %883 = vmatpush.bf16.msra.mxu2 %v1540_v36 }
  0xa5   :  { %822 = vmatpush.bf16.msra.mxu1 %v1548_v37 }
  0xa7   :  { %884 = vmatpush.bf16.msra.mxu2 %v1539_v48 }
  0xa9   :  { %823 = vmatpush.bf16.msra.mxu1 %v1547_v49 }
 0x115   :  { %v180_v50 = vpop.f32.mrf.mxu1 }
 0x119   :  { %v241_v52 = vpop.f32.mrf.mxu2 }
 0x11a   :  { %v242_v53 = vadd.f32 %v241_v52, %v180_v50  ;;  %v1538_v50 = vld [vmem:[#allocation5 + $0x210] sm:$0xff]  ;;  %v1537_v52 = vld [vmem:[#allocation5 + $0x208] sm:$0xff] }
 0x11b   :  { %885 = vmatpush.bf16.msra.mxu2 %v1538_v50 }
 0x11c   :  { %v247_v54 = vadd.f32 %v1574_v51, %v242_v53  ;;  %v1546_v51 = vld [vmem:[#allocation5 + $0x250] sm:$0xff]  ;;  %v1545_v53 = vld [vmem:[#allocation5 + $0x248] sm:$0xff] }
 0x11d   :  { %v182_v55 = vpop.f32.mrf.mxu1  ;;  %824 = vmatpush.bf16.msra.mxu1 %v1546_v51 }
 0x11e   :  { %v282_v56 = vpack.c.bf16 %v247_v54, %v247_v54  ;;  %v283_v57 = vand.u32 2147483647, %v247_v54  ;;  %v1536_v54 = vld [vmem:[#allocation5 + $0x200] sm:$0xff] }
 0x11f   :  { %886 = vmatpush.bf16.msra.mxu2 %v1537_v52  ;;  %v1544_v55 = vld [vmem:[#allocation5 + $0x240] sm:$0xff] }
 0x120   :  { %402 = vmatmul.bf16.vlgmr.msrb.gmra.mxu0 %v282_v56  ;;  %v284_v58 = vpack.c.bf16 %v283_v57, %v283_v57  ;;  %v1559_v56 = vld [vmem:[#allocation5 + $0x2b8] sm:$0xff] }
 0x121   :  { %v243_v59 = vpop.f32.mrf.mxu2  ;;  %825 = vmatpush.bf16.msra.mxu1 %v1545_v53  ;;  %v1567_v57 = vld [vmem:[#allocation5 + $0x2f8] sm:$0xff]  ;;  %1042 = vmatpush.bf16.msrb.mxu0 %v1559_v56 }
 0x122   :  { %341 = vmatmul.bf16.vlgmr.msra.gmra.mxu3 %v284_v58  ;;  %v1558_v58 = vld [vmem:[#allocation5 + $0x2b0] sm:$0xff] }
 0x123   :  { %887 = vmatpush.bf16.msra.mxu2 %v1536_v54  ;;  %981 = vmatpush.bf16.msra.mxu3 %v1567_v57  ;;  %v1566_v59 = vld [vmem:[#allocation5 + $0x2f0] sm:$0xff] }
 0x125   :  { %826 = vmatpush.bf16.msra.mxu1 %v1544_v55  ;;  %1043 = vmatpush.bf16.msrb.mxu0 %v1558_v58 }
 0x127   :  { %982 = vmatpush.bf16.msra.mxu3 %v1566_v59 }
 0x129   :  { %1044 = vmatpush.bf16.msrb.mxu0 %v1557_v60 }
 0x12b   :  { %983 = vmatpush.bf16.msra.mxu3 %v1565_v61 }
 0x12d   :  { %1045 = vmatpush.bf16.msrb.mxu0 %v1556_v62 }
 0x12f   :  { %984 = vmatpush.bf16.msra.mxu3 %v1564_v63 }
 0x131   :  { %1046 = vmatpush.bf16.msrb.mxu0 %v1555_v0 }
 0x133   :  { %985 = vmatpush.bf16.msra.mxu3 %v1563_v1 }
 0x135   :  { %1047 = vmatpush.bf16.msrb.mxu0 %v1554_v12 }
 0x137   :  { %986 = vmatpush.bf16.msra.mxu3 %v1562_v13 }
 0x19d   :  { %v403_v14 = vpop.f32.mrf.mxu0 }
 0x1a5   :  { %v342_v16 = vpop.f32.mrf.mxu3  ;;  %v405_v17 = vpop.f32.mrf.mxu0 }
 0x1a6   :  { %v404_v18 = vadd.f32 %v403_v14, %v342_v16  ;;  %v1553_v14 = vld [vmem:[#allocation5 + $0x288] sm:$0xff]  ;;  %v1552_v16 = vld [vmem:[#allocation5 + $0x280] sm:$0xff] }
 0x1a7   :  { %1048 = vmatpush.bf16.msrb.mxu0 %v1553_v14  ;;  %v1560_v17 = vld [vmem:[#allocation5 + $0x2c0] sm:$0xff] }
 0x1a8   :  { %v409_v19 = vadd.f32 %v1575_v15, %v404_v18  ;;  %v1561_v15 = vld [vmem:[#allocation5 + $0x2c8] sm:$0xff] }
 0x1a9   :  { %987 = vmatpush.bf16.msra.mxu3 %v1561_v15 }
 0x1aa   :  { %v444_v20 = vpack.c.bf16 %v409_v19, %v409_v19  ;;  %v445_v21 = vand.u32 2147483647, %v409_v19  ;;  %v1578_v19 = vld [vmem:[%s1724_s3 + $0x5] ss:$0 sm:$0xff] }
 0x1ab   :  { %1049 = vmatpush.bf16.msrb.mxu0 %v1552_v16 }
 0x1ac   :  { %564 = vmatmul.bf16.vlgmr.msrb.gmra.mxu2 %v444_v20  ;;  %v446_v22 = vpack.c.bf16 %v445_v21, %v445_v21 }
 0x1ad   :  { %v344_v23 = vpop.f32.mrf.mxu3  ;;  %988 = vmatpush.bf16.msra.mxu3 %v1560_v17 }
 0x1ae   :  { %503 = vmatmul.bf16.vlgmr.msrb.gmra.mxu1 %v446_v22 }
 0x22b   :  { %v504_v38 = vpop.f32.mrf.mxu1 }
 0x22f   :  { %v565_v40 = vpop.f32.mrf.mxu2 }
 0x230   :  { %v566_v41 = vadd.f32 %v565_v40, %v504_v38 }
 0x232   :  { %v571_v42 = vadd.f32 %v1576_v39, %v566_v41 }
 0x233   :  { %v506_v43 = vpop.f32.mrf.mxu1 }
 0x234   :  { %v606_v44 = vpack.c.bf16 %v571_v42, %v571_v42  ;;  %v607_v45 = vand.u32 2147483647, %v571_v42 }
 0x236   :  { %726 = vmatmul.bf16.vlgmr.msra.gmra.mxu0 %v606_v44  ;;  %v608_v46 = vpack.c.bf16 %v607_v45, %v607_v45 }
 0x237   :  { %v567_v47 = vpop.f32.mrf.mxu2 }
 0x238   :  { %665 = vmatmul.bf16.vlgmr.msrb.gmra.mxu3 %v608_v46 }
 0x2b3   :  { %v727_v2 = vpop.f32.mrf.mxu0 }
 0x2bb   :  { %v666_v4 = vpop.f32.mrf.mxu3  ;;  %v729_v5 = vpop.f32.mrf.mxu0 }
 0x2bc   :  { %v728_v6 = vadd.f32 %v727_v2, %v666_v4 }
 0x2be   :  { %v733_v7 = vadd.f32 %v1577_v3, %v728_v6 }
 0x2c0   :  { %v768_v8 = vpack.c.bf16 %v733_v7, %v733_v7  ;;  %v769_v9 = vand.u32 2147483647, %v733_v7 }
 0x2c2   :  { %v770_v10 = vpack.c.bf16 %v769_v9, %v769_v9  ;;  %888 = vmatmul.bf16.vlgmr.msra.gmra.mxu2 %v768_v8 }
 0x2c3   :  { %v668_v11 = vpop.f32.mrf.mxu3 }
 0x2c4   :  { %827 = vmatmul.bf16.vlgmr.msra.gmra.mxu1 %v770_v10 }
 0x341   :  { %v828_v18 = vpop.f32.mrf.mxu1 }
 0x345   :  { %v889_v20 = vpop.f32.mrf.mxu2 }
 0x346   :  { %v890_v21 = vadd.f32 %v889_v20, %v828_v18 }
 0x348   :  { %v895_v22 = vadd.f32 %v1578_v19, %v890_v21 }
 0x349   :  { %v830_v23 = vpop.f32.mrf.mxu1 }
 0x34a   :  { %v930_v24 = vpack.c.bf16 %v895_v22, %v895_v22  ;;  %v931_v25 = vand.u32 2147483647, %v895_v22 }
 0x34c   :  { %v932_v26 = vpack.c.bf16 %v931_v25, %v931_v25  ;;  %1050 = vmatmul.bf16.vlgmr.msrb.gmra.mxu0 %v930_v24 }
 0x34d   :  { %v891_v27 = vpop.f32.mrf.mxu2 }
 0x34e   :  { %989 = vmatmul.bf16.vlgmr.msra.gmra.mxu3 %v932_v26 }
 0x3c9   :  { %v1051_v28 = vpop.f32.mrf.mxu0 }
 0x3d1   :  { %v990_v30 = vpop.f32.mrf.mxu3  ;;  %v1053_v31 = vpop.f32.mrf.mxu0 }
 0x3d2   :  { %v1052_v32 = vadd.f32 %v1051_v28, %v990_v30 }
 0x3d4   :  { %v1057_v33 = vadd.f32 %v1579_v29, %v1052_v32 }
 0x3d6   :  { %1058 = vst [vmem:[#allocation7] sm:$0xff] %v1057_v33 }
 0x3d7   :  { %1069 = dma.vmem_to_hbm [thread:$0]  %s1065_s15, 128, %s1067_s18, [#allocation4]  }
 0x3d9   :  { %v992_v34 = vpop.f32.mrf.mxu3 }
 0x3da   :  { %1656 = dma.done.wait [#allocation4], 128  }
 0x3db   :  { %1657 = vsyncadd [#allocation4], 4294967168 }
 0x3dc   :  { %1074 = vsyncpa [#allocation3], 1 }
 0x3dd   :  { %1075 = vsyncpa [#allocation6], 1 }
 0x3de   :  { %1076 = vsyncpa [#allocation4], 1 }

</bundles_post_ra>
